<compile_context>
chip_gen: v6e
topology: v6e:2x2x1
jax: 0.10.0
libtpu: 0.0.40
codegen_flags: <defaults>
</compile_context>

<pallas_src>
import math
import jax
import jax.numpy as jnp
from jax.experimental import pallas as pl
from jax.experimental.pallas import tpu as pltpu


def _round_up(n: int, m: int) -> int:
    return ((n + m - 1) // m) * m


def _fused_mlp_kernel(wct_ref, bc_ref, xt_ref, yt_ref):
    """y^T = Wc^T @ x^T + bc  as 6 scalar-broadcast VPU FMAs.

    wct_ref: (2, 3) f32 SMEM  -- fused weight, transposed (= W1 @ W0)
    bc_ref : (2,)   f32 SMEM  -- fused bias   (= b0 @ W1^T + b1)
    xt_ref : (3, TILE_B) f32 VMEM -- batch on the lane axis (lane dense)
    yt_ref : (2, TILE_B) f32 VMEM
    """
    x0 = xt_ref[0:1, :]   # (1, TILE_B)
    x1 = xt_ref[1:2, :]
    x2 = xt_ref[2:3, :]
    # Static unroll over the 2 output features: pure VPU work, no MXU.
    for j in range(2):
        yt_ref[j:j + 1, :] = (wct_ref[j, 0] * x0
                              + wct_ref[j, 1] * x1
                              + wct_ref[j, 2] * x2
                              + bc_ref[j])


def net_old_forward(x, w0, b0, w1, b1, *,
                    tile_b_max: int = 16384,
                    force_pallas: bool = False):
    """x: (B, 3) f32; w0: (2, 3); b0: (2,); w1: (2, 2); b1: (2,) -> (B, 2) f32."""
    B = x.shape[0]
    x = x.astype(jnp.float32)

    # --- fuse the two linear layers (exact) -------------------------------
    wct = (w1 @ w0).astype(jnp.float32)            # (2, 3)  == (W0^T W1^T)^T
    bc = (b0 @ w1.T + b1).astype(jnp.float32)      # (2,)

    # --- tiny-batch fallback: kernel launch overhead dwarfs the math ------
    if B < 512 and not force_pallas:
        return x @ wct.T + bc

    # --- batch tiling: 128-aligned lane tiles, padded tail ----------------
    tile_b = min(tile_b_max, _round_up(B, 128))    # multiple of 128
    b_pad = _round_up(B, tile_b)

    xt = x.T                                       # (3, B) feature-major
    if b_pad != B:
        xt = jnp.pad(xt, ((0, 0), (0, b_pad - B)))

    grid = (b_pad // tile_b,)

    yt = pl.pallas_call(
        _fused_mlp_kernel,
        out_shape=jax.ShapeDtypeStruct((2, b_pad), jnp.float32),
        grid_spec=pltpu.PrefetchScalarGridSpec(
            num_scalar_prefetch=0,
            grid=grid,
            in_specs=[
                # Fused weight / bias: tiny, resident in SMEM for the whole grid.
                pl.BlockSpec(memory_space=pltpu.MemorySpace.SMEM),   # wct (2,3)
                pl.BlockSpec(memory_space=pltpu.MemorySpace.SMEM),   # bc  (2,)
                # Activations: lane-dense (3, TILE_B) blocks, pipelined over batch.
                pl.BlockSpec((3, tile_b), lambda i: (0, i)),
            ],
            out_specs=pl.BlockSpec((2, tile_b), lambda i: (0, i)),
        ),
        compiler_params=pltpu.CompilerParams(
            dimension_semantics=("parallel",),     # split batch across TCs (v7x)
        ),
    )(wct, bc, xt)

    return yt[:, :B].T                             # (B, 2)


def init_params(key):
    """Deterministic kaiming_uniform(a=sqrt(5)) + uniform bias, like torch."""
    k0, k1, k2, k3 = jax.random.split(key, 4)

    def kaiming_bound(fan_in, a=math.sqrt(5)):
        gain = math.sqrt(2.0 / (1.0 + a * a))
        return gain * math.sqrt(3.0 / fan_in)

    # weight_l0: (2, 3) -> fan_in = 3
    bw0 = kaiming_bound(3)
    w0 = jax.random.uniform(k0, (2, 3), jnp.float32, -bw0, bw0)
    bb0 = 1.0 / math.sqrt(3)
    b0 = jax.random.uniform(k1, (2,), jnp.float32, -bb0, bb0)

    # weight_l1: (2, 2) -> fan_in = 2
    bw1 = kaiming_bound(2)
    w1 = jax.random.uniform(k2, (2, 2), jnp.float32, -bw1, bw1)
    bb1 = 1.0 / math.sqrt(2)
    b1 = jax.random.uniform(k3, (2,), jnp.float32, -bb1, bb1)
    return w0, b0, w1, b1


# TODO(synk): forward_transfer_rates / backward gradient hooks are autograd
# bookkeeping, not part of the forward pass; intentionally not implemented.

if __name__ == "__main__":
    key = jax.random.PRNGKey(0)
    kx, kp = jax.random.split(key)
    w0, b0, w1, b1 = init_params(kp)

    # Small test matching the module's forward (features = 3 -> 2 -> 2).
    B = 8
    x = jax.random.normal(kx, (B, 3), jnp.float32)

    out = net_old_forward(x, w0, b0, w1, b1, force_pallas=True)
    out = jax.block_until_ready(out)
    ref = (x @ w0.T + b0) @ w1.T + b1
    assert out.shape == (B, 2)
    assert jnp.allclose(out, ref, atol=1e-5, rtol=1e-5)

    # Second check: non-128-multiple batch with a multi-step grid (tail padding
    # + pipelined batch tiles exercised).
    B2 = 1000
    x2 = jax.random.normal(jax.random.PRNGKey(1), (B2, 3), jnp.float32)
    out2 = net_old_forward(x2, w0, b0, w1, b1, tile_b_max=256, force_pallas=True)
    out2 = jax.block_until_ready(out2)
    ref2 = (x2 @ w0.T + b0) @ w1.T + b1
    assert out2.shape == (B2, 2)
    assert jnp.allclose(out2, ref2, atol=1e-5, rtol=1e-5)

    print("KERNEL_OK")
</pallas_src>

<mosaic_0001>
module attributes {stable_mosaic.version = 11 : i64} {
  func.func @_fused_mlp_kernel(%arg0: i32, %arg1: memref<2x3xf32, #tpu.memory_space<smem>>, %arg2: memref<2xf32, #tpu.memory_space<smem>>, %arg3: memref<3x128xf32, #tpu.memory_space<vmem>>, %arg4: memref<2x128xf32, #tpu.memory_space<vmem>>) attributes {dimension_semantics = [#tpu.dimension_semantics<parallel>], iteration_bounds = array<i64: 1>, scalar_prefetch = 0 : i64, scratch_operands = 0 : i64, tpu.core_type = #tpu.core_type<tc>, window_params = [{transform_indices = @transform_0, window_bounds = array<i64: 2, 3>}, {transform_indices = @transform_1, window_bounds = array<i64: 2>}, {transform_indices = @transform_2, window_bounds = array<i64: 3, 128>}, {transform_indices = @transform_3, window_bounds = array<i64: 2, 128>}]} {
    %c0 = arith.constant 0 : index
    %c0_0 = arith.constant 0 : index
    %0 = vector.load %arg3[%c0, %c0_0] : memref<3x128xf32, #tpu.memory_space<vmem>>, vector<1x128xf32>
    %c1 = arith.constant 1 : index
    %c0_1 = arith.constant 0 : index
    %1 = vector.load %arg3[%c1, %c0_1] : memref<3x128xf32, #tpu.memory_space<vmem>>, vector<1x128xf32>
    %c2 = arith.constant 2 : index
    %c0_2 = arith.constant 0 : index
    %2 = vector.load %arg3[%c2, %c0_2] : memref<3x128xf32, #tpu.memory_space<vmem>>, vector<1x128xf32>
    %c0_3 = arith.constant 0 : index
    %c0_4 = arith.constant 0 : index
    %3 = memref.load %arg1[%c0_3, %c0_4] : memref<2x3xf32, #tpu.memory_space<smem>>
    %4 = vector.broadcast %3 : f32 to vector<1x128xf32>
    %5 = arith.mulf %4, %0 : vector<1x128xf32>
    %c0_5 = arith.constant 0 : index
    %c1_6 = arith.constant 1 : index
    %6 = memref.load %arg1[%c0_5, %c1_6] : memref<2x3xf32, #tpu.memory_space<smem>>
    %7 = vector.broadcast %6 : f32 to vector<1x128xf32>
    %8 = arith.mulf %7, %1 : vector<1x128xf32>
    %9 = arith.addf %5, %8 : vector<1x128xf32>
    %c0_7 = arith.constant 0 : index
    %c2_8 = arith.constant 2 : index
    %10 = memref.load %arg1[%c0_7, %c2_8] : memref<2x3xf32, #tpu.memory_space<smem>>
    %11 = vector.broadcast %10 : f32 to vector<1x128xf32>
    %12 = arith.mulf %11, %2 : vector<1x128xf32>
    %13 = arith.addf %9, %12 : vector<1x128xf32>
    %c0_9 = arith.constant 0 : index
    %14 = memref.load %arg2[%c0_9] : memref<2xf32, #tpu.memory_space<smem>>
    %15 = vector.broadcast %14 : f32 to vector<1x128xf32>
    %16 = arith.addf %13, %15 : vector<1x128xf32>
    %c0_10 = arith.constant 0 : index
    %c0_11 = arith.constant 0 : index
    %17 = vector.load %arg4[%c0_10, %c0_11] : memref<2x128xf32, #tpu.memory_space<vmem>>, vector<1x128xf32>
    tpu.vector_store %arg4[%c0_10, %c0_11], %16 {strides = array<i32>} : memref<2x128xf32, #tpu.memory_space<vmem>>, vector<1x128xf32>,
    %c1_12 = arith.constant 1 : index
    %c0_13 = arith.constant 0 : index
    %18 = memref.load %arg1[%c1_12, %c0_13] : memref<2x3xf32, #tpu.memory_space<smem>>
    %19 = vector.broadcast %18 : f32 to vector<1x128xf32>
    %20 = arith.mulf %19, %0 : vector<1x128xf32>
    %c1_14 = arith.constant 1 : index
    %c1_15 = arith.constant 1 : index
    %21 = memref.load %arg1[%c1_14, %c1_15] : memref<2x3xf32, #tpu.memory_space<smem>>
    %22 = vector.broadcast %21 : f32 to vector<1x128xf32>
    %23 = arith.mulf %22, %1 : vector<1x128xf32>
    %24 = arith.addf %20, %23 : vector<1x128xf32>
    %c1_16 = arith.constant 1 : index
    %c2_17 = arith.constant 2 : index
    %25 = memref.load %arg1[%c1_16, %c2_17] : memref<2x3xf32, #tpu.memory_space<smem>>
    %26 = vector.broadcast %25 : f32 to vector<1x128xf32>
    %27 = arith.mulf %26, %2 : vector<1x128xf32>
    %28 = arith.addf %24, %27 : vector<1x128xf32>
    %c1_18 = arith.constant 1 : index
    %29 = memref.load %arg2[%c1_18] : memref<2xf32, #tpu.memory_space<smem>>
    %30 = vector.broadcast %29 : f32 to vector<1x128xf32>
    %31 = arith.addf %28, %30 : vector<1x128xf32>
    %c1_19 = arith.constant 1 : index
    %c0_20 = arith.constant 0 : index
    %32 = vector.load %arg4[%c1_19, %c0_20] : memref<2x128xf32, #tpu.memory_space<vmem>>, vector<1x128xf32>
    tpu.vector_store %arg4[%c1_19, %c0_20], %31 {strides = array<i32>} : memref<2x128xf32, #tpu.memory_space<vmem>>, vector<1x128xf32>,
    return
  }
  func.func @transform_0(%arg0: i32) -> (i32, i32) {
    %c0_i32 = arith.constant 0 : i32
    %c0_i32_0 = arith.constant 0 : i32
    %c0_i32_1 = arith.constant 0 : i32
    return %c0_i32, %c0_i32_0 : i32, i32
  }
  func.func @transform_1(%arg0: i32) -> i32 {
    %c0_i32 = arith.constant 0 : i32
    %c0_i32_0 = arith.constant 0 : i32
    return %c0_i32 : i32
  }
  func.func @transform_2(%arg0: i32) -> (i32, i32) {
    %c0_i32 = arith.constant 0 : i32
    %c0_i32_0 = arith.constant 0 : i32
    return %c0_i32, %arg0 : i32, i32
  }
  func.func @transform_3(%arg0: i32) -> (i32, i32) {
    %c0_i32 = arith.constant 0 : i32
    %c0_i32_0 = arith.constant 0 : i32
    return %c0_i32, %arg0 : i32, i32
  }
}

</mosaic_0001>

<bundles_post_ra>
// kernel: tpu_custom_call.1
= control target key start
LH: loop header
LB: loop body
LE: loop exit
PB: predicated region body
PF: predicated region fallthrough
CT: control target
= control target key end

     0   :  { %8 = vsyncpa [#allocation5], 0  ;;  %s214_s0 = inlined_call_operand.hbm [shape: f32[2,3], index: 0, kind: input, shape index: {}]   ;;  %s215_s1 = inlined_call_operand.vmem [shape: f32[2], index: 1, kind: input, shape index: {}]   ;;  %s216_s2 = inlined_call_operand.hbm [shape: f32[3,128], index: 2, kind: input, shape index: {}]   ;;  %s217_s3 = inlined_call_operand.hbm [shape: f32[2,128], index: 3, kind: output, shape index: {}]  }
   0x1   :  { %9 = vsyncpa [#allocation6], 0 }
   0x2   :  { %10 = vsyncpa [#allocation3], 0 }
   0x3   :  { %11 = vsyncpa [#allocation4], 0  ;;  %s26_s14 = sshll.u32 %s215_s1, 4  ;;  %s178_s15 = smov [#allocation2]   ;;  %s27_s14 = int_to_ptr.vmem [resolvable:$true] %s26_s14 }
   0x4   :  { %19 = dma.hbm_to_smem %s214_s0, 32, %s178_s15, [#allocation5]  }
   0x5   :  { %s118_s18 = scalar_lea.vmem %s27_s14, 16  ;;  %p123_p1 = scmp.lt.s32.totalorder %s27_s14, %s27_s14 }
   0x6   :  { %p119_p0 = scmp.ne.s32.totalorder %s27_s14, %s118_s18  ;;  %p124_p2 = scmp.lt.s32.totalorder %s118_s18, %s118_s18 }
   0x8   :  { %p125_p3 = por %p124_p2, %p123_p1 }
   0xa   :  { %p126_p4 = pnand %p125_p3, %p119_p0 }
   0xc   :  { %129 = shalt.err (!%p126_p4)
}
   0xd   :  { %s179_s19 = smov [#allocation7]   ;;  %s180_s20 = smov [#allocation8]  }
   0xe   :  { %29 = dma.vmem_to_smem %s27_s14, 16, %s179_s19, [#allocation6]  }
   0xf   :  { %s36_s21 = sshll.u32 %s180_s20, 4  ;;  %s37_s21 = int_to_ptr.vmem [resolvable:$true] %s36_s21 }
  0x10   :  { %s138_s22 = scalar_lea.vmem %s37_s21, 64  ;;  %p143_p6 = scmp.lt.s32.totalorder %s37_s21, %s37_s21 }
  0x11   :  { %p139_p5 = scmp.ne.s32.totalorder %s37_s21, %s138_s22  ;;  %p144_p7 = scmp.lt.s32.totalorder %s138_s22, %s138_s22 }
  0x13   :  { %p145_p8 = por %p144_p7, %p143_p6 }
  0x15   :  { %p146_p9 = pnand %p145_p8, %p139_p5 }
  0x17   :  { %149 = shalt.err (!%p146_p9)
}
  0x18   :  { %39 = dma.hbm_to_vmem [thread:$0]  %s216_s2, 64, %s37_s21, [#allocation3]  }
  0x19   :  { %170 = dma.done.wait [#allocation5], 32  }
  0x1a   :  { %171 = vsyncadd [#allocation5], 4294967264 }
  0x1b   :  { %172 = dma.done.wait [#allocation6], 16  }
  0x1c   :  { %173 = vsyncadd [#allocation6], 4294967280 }
  0x1d   :  { %174 = dma.done.wait [#allocation3], 64  }
  0x1e   :  { %175 = vsyncadd [#allocation3], 4294967232 }
  0x1f   :  { %49 = sfence }
  0x20   :  { %s53_s23 = sld [smem:[#allocation2]]  ;;  %v50_v0 = vld [vmem:[#allocation8] sm:$0x1]  ;;  %v51_v1 = vld [vmem:[#allocation8 + $0x1] sm:$0x1]  ;;  %s181_s30 = smov [#allocation9]  }
  0x21   :  { %s100_s24 = sld [smem:[#allocation2 + $0x1]]  ;;  %v52_v2 = vld [vmem:[#allocation8 + $0x2] sm:$0x1]  ;;  %s89_s4 = sshll.u32 %s181_s30, 4  ;;  %s90_s4 = int_to_ptr.vmem [resolvable:$true] %s89_s4 }
  0x22   :  { %s101_s25 = sld [smem:[#allocation2 + $0x2]]  ;;  %s150_s5 = scalar_lea.vmem %s90_s4, 32 }
  0x23   :  { %s64_s26 = sld [smem:[#allocation7]]  ;;  %p151_p10 = scmp.ne.s32.totalorder %s90_s4, %s150_s5 }
  0x24   :  { %s102_s27 = sld [smem:[#allocation2 + $0x80]]  ;;  %p155_p11 = scmp.lt.s32.totalorder %s90_s4, %s90_s4 }
  0x25   :  { %s103_s28 = sld [smem:[#allocation2 + $0x81]]  ;;  %p156_p12 = scmp.lt.s32.totalorder %s150_s5, %s150_s5 }
  0x26   :  { %v54_v3 = vstv %s53_s23  ;;  %s104_s29 = sld [smem:[#allocation2 + $0x82]] }
  0x27   :  { %v55_v4 = vmul.f32 %v54_v3, %v50_v0  ;;  %v57_v5 = vstv %s100_s24  ;;  %s105_s2 = sld [smem:[#allocation7 + $0x1]]  ;;  %p157_p13 = por %p156_p12, %p155_p11 }
  0x28   :  { %v58_v6 = vmul.f32 %v57_v5, %v51_v1  ;;  %v61_v7 = vstv %s101_s25 }
  0x29   :  { %v62_v8 = vmul.f32 %v61_v7, %v52_v2  ;;  %v65_v11 = vstv %s64_s26  ;;  %p158_p0 = pnand %p157_p13, %p151_p10 }
  0x2a   :  { %v59_v9 = vadd.f32 %v58_v6, %v55_v4  ;;  %v69_v10 = vstv %s102_s27 }
  0x2b   :  { %v70_v12 = vmul.f32 %v69_v10, %v50_v0  ;;  %v72_v13 = vstv %s103_s28 }
  0x2c   :  { %v63_v14 = vadd.f32 %v62_v8, %v59_v9  ;;  %v73_v15 = vmul.f32 %v72_v13, %v51_v1  ;;  %v76_v16 = vstv %s104_s29 }
  0x2d   :  { %v77_v17 = vmul.f32 %v76_v16, %v52_v2  ;;  %v80_v20 = vstv %s105_s2 }
  0x2e   :  { %v66_v18 = vadd.f32 %v65_v11, %v63_v14  ;;  %v74_v19 = vadd.f32 %v73_v15, %v70_v12 }
  0x30   :  { %67 = vst [vmem:[#allocation9] sm:$0x1] %v66_v18  ;;  %v78_v21 = vadd.f32 %v77_v17, %v74_v19 }
  0x32   :  { %v81_v22 = vadd.f32 %v80_v20, %v78_v21 }
  0x34   :  { %82 = vst [vmem:[#allocation9 + $0x1] sm:$0x1] %v81_v22 }
  0x35   :  { %161 = shalt.err (!%p158_p0)
}
  0x36   :  { %92 = dma.vmem_to_hbm [thread:$0]  %s90_s4, 32, %s217_s3, [#allocation4]  }
  0x37   :  { %176 = dma.done.wait [#allocation4], 32  }
  0x38   :  { %177 = vsyncadd [#allocation4], 4294967264 }
  0x39   :  { %96 = vsyncpa [#allocation3], 1 }
  0x3a   :  { %97 = vsyncpa [#allocation4], 1 }
  0x3b   :  { %98 = vsyncpa [#allocation5], 1 }
  0x3c   :  { %99 = vsyncpa [#allocation6], 1 }

</bundles_post_ra>
